<compile_context>
chip_gen: v7x
topology: tpu7x:2x2x1
jax: 0.10.0
libtpu: 0.0.40
codegen_flags: <defaults>
</compile_context>

<pallas_src>
import functools

import jax
import jax.numpy as jnp
from jax.experimental import pallas as pl
from jax.experimental.pallas import tpu as pltpu

_MAX_BLOCK_BYTES = 2 * 1024 * 1024  # per-input block; v7x-safe, near roofline on v5e/v6e


def _min_kernel(y_ref, std_ref, mean_ref, o_ref, acc_ref, *,
                rows_total, block_rows, needs_mask):
    """Pass 1: global min of yd = y * y_std + y_mean."""
    i = pl.program_id(0)

    @pl.when(i == 0)
    def _():
        acc_ref[...] = jnp.full_like(acc_ref, jnp.inf)

    y = y_ref[...].astype(jnp.float32)
    std = std_ref[...].astype(jnp.float32)
    mean = mean_ref[...].astype(jnp.float32)
    yd = y * std + mean
    if needs_mask:
        row = jax.lax.broadcasted_iota(jnp.int32, yd.shape, 0) + i * block_rows
        yd = jnp.where(row < rows_total, yd, jnp.inf)

    # sublane-only reduce per step; lanes stay resident in the accumulator
    acc_ref[...] = jnp.minimum(acc_ref[...], jnp.min(yd, axis=0, keepdims=True))

    @pl.when(i == pl.num_programs(0) - 1)
    def _():
        o_ref[...] = jnp.min(acc_ref[...]).reshape(1, 1)


def _wsq_sum_kernel(scal_ref, y_ref, yp_ref, std_ref, mean_ref, o_ref, acc_ref, *,
                    rows_total, block_rows, needs_mask):
    """Pass 2: sum of w * (yd - yd_pred)^2 with w = dwt / (dwt + yd - ymin)."""
    i = pl.program_id(0)

    @pl.when(i == 0)
    def _():
        acc_ref[...] = jnp.zeros_like(acc_ref)

    dwt = scal_ref[0, 0]     # SMEM scalar
    ymin = scal_ref[0, 1]    # SMEM scalar

    y = y_ref[...].astype(jnp.float32)
    yp = yp_ref[...].astype(jnp.float32)
    std = std_ref[...].astype(jnp.float32)
    mean = mean_ref[...].astype(jnp.float32)

    yd = y * std + mean
    diff = (y - yp) * std                      # == yd - yd_pred
    w = dwt / (dwt + yd - ymin)
    contrib = w * diff * diff
    if needs_mask:
        row = jax.lax.broadcasted_iota(jnp.int32, contrib.shape, 0) + i * block_rows
        contrib = jnp.where(row < rows_total, contrib, 0.0)

    acc_ref[...] += jnp.sum(contrib, axis=0, keepdims=True)

    @pl.when(i == pl.num_programs(0) - 1)
    def _():
        o_ref[...] = jnp.sum(acc_ref[...]).reshape(1, 1)


def _choose_block_rows(n_rows, n_cols, itemsize, max_block_bytes):
    cap = max(8, (max_block_bytes // max(1, n_cols * itemsize)) // 8 * 8)
    if n_rows <= cap:
        return n_rows            # full-extent block (always a legal block shape)
    return cap                   # multiple-of-8 sublane block


def _lane_dense_repack(y, y_pred, std2d, mean2d, n_rows, n_cols):
    """Free (metadata-only) reshape to a lane-dense (rows, L) layout when legal."""
    total = n_rows * n_cols
    if n_cols <= 128 and 128 % n_cols == 0:
        for lane in (1024, 512, 256, 128):
            if total % lane == 0:
                rows = total // lane
                reps = lane // n_cols
                return (y.reshape(rows, lane),
                        y_pred.reshape(rows, lane),
                        jnp.tile(std2d, (1, reps)),
                        jnp.tile(mean2d, (1, reps)),
                        rows, lane)
    # Fallback: original layout (already lane-dense if n_cols is a 128 multiple,
    # otherwise correctness-first with in-VMEM lane padding).
    return y, y_pred, std2d, mean2d, n_rows, n_cols


def wrmse_loss_ratio(y, y_pred, y_mean, y_std, dwt=1.0, *,
                     max_block_bytes=_MAX_BLOCK_BYTES):
    """Pallas equivalent of WRMSELoss_Ratio.forward(y, y_pred)."""
    assert y.shape == y_pred.shape and y.ndim == 2
    n_rows, n_cols = y.shape
    itemsize = jnp.dtype(y.dtype).itemsize
    n_elems_total = n_rows * n_cols

    std2d = jnp.asarray(y_std, jnp.float32).reshape(1, n_cols)
    mean2d = jnp.asarray(y_mean, jnp.float32).reshape(1, n_cols)

    # Lane-dense view of the same HBM bytes (no copy) whenever shapes allow.
    y2, yp2, std2d, mean2d, rows, cols = _lane_dense_repack(
        y, y_pred, std2d, mean2d, n_rows, n_cols)

    block_rows = _choose_block_rows(rows, cols, itemsize, max_block_bytes)
    grid = (pl.cdiv(rows, block_rows),)
    needs_mask = (rows % block_rows) != 0

    compiler_params = pltpu.CompilerParams(dimension_semantics=("arbitrary",))
    row_spec = pl.BlockSpec((block_rows, cols), lambda i: (i, 0))
    vec_spec = pl.BlockSpec((1, cols), lambda i: (0, 0))
    out_spec = pl.BlockSpec((1, 1), lambda i: (0, 0))

    # ---- pass 1: global min of yd ----
    bytes_a = y.size * itemsize + 2 * cols * 4 + 4
    ymin = pl.pallas_call(
        functools.partial(_min_kernel, rows_total=rows,
                          block_rows=block_rows, needs_mask=needs_mask),
        out_shape=jax.ShapeDtypeStruct((1, 1), jnp.float32),
        grid_spec=pltpu.PrefetchScalarGridSpec(
            num_scalar_prefetch=0,
            grid=grid,
            in_specs=[row_spec, vec_spec, vec_spec],
            out_specs=out_spec,
            scratch_shapes=[pltpu.VMEM((1, cols), jnp.float32)],
        ),
        compiler_params=compiler_params,
        cost_estimate=pl.CostEstimate(flops=4 * y.size, transcendentals=0,
                                      bytes_accessed=bytes_a),
    )(y2, std2d, mean2d)

    # runtime scalars (SMEM) -> no recompile when dwt changes
    scal = jnp.concatenate(
        [jnp.asarray(dwt, jnp.float32).reshape(1, 1), ymin], axis=1)  # (1, 2)

    # ---- pass 2: sum of w * (yd - yd_pred)^2 ----
    bytes_b = 2 * y.size * itemsize + 2 * cols * 4 + 8 + 4
    wsq_sum = pl.pallas_call(
        functools.partial(_wsq_sum_kernel, rows_total=rows,
                          block_rows=block_rows, needs_mask=needs_mask),
        out_shape=jax.ShapeDtypeStruct((1, 1), jnp.float32),
        grid_spec=pltpu.PrefetchScalarGridSpec(
            num_scalar_prefetch=0,
            grid=grid,
            in_specs=[
                pl.BlockSpec(memory_space=pltpu.MemorySpace.SMEM),  # [dwt, ymin]
                row_spec,   # y
                row_spec,   # y_pred
                vec_spec,   # y_std (tiled to lane width on the dense path)
                vec_spec,   # y_mean
            ],
            out_specs=out_spec,
            scratch_shapes=[pltpu.VMEM((1, cols), jnp.float32)],
        ),
        compiler_params=compiler_params,
        cost_estimate=pl.CostEstimate(flops=10 * y.size, transcendentals=0,
                                      bytes_accessed=bytes_b),
    )(scal, y2, yp2, std2d, mean2d)

    return jnp.sqrt(wsq_sum[0, 0] / jnp.float32(n_elems_total))


def _ref_wrmse(y, y_pred, y_mean, y_std, dwt):
    """Plain-JAX reference mirroring the PyTorch module."""
    yd = y * y_std + y_mean
    yd_pred = y_pred * y_std + y_mean
    ymin = yd.min()
    w = dwt / (dwt + yd - ymin)
    return jnp.sqrt(jnp.mean(w * (yd - yd_pred) ** 2))


if __name__ == "__main__":
    key = jax.random.PRNGKey(0)
    k1, k2, k3, k4 = jax.random.split(key, 4)

    # --- test 1: small shapes (batch, num_targets), lane-dense single-step path
    B, T = 64, 8
    dwt = 1.0
    y = jax.random.normal(k1, (B, T), dtype=jnp.float32)
    y_pred = y + 0.1 * jax.random.normal(k2, (B, T), dtype=jnp.float32)
    y_mean = jax.random.normal(k3, (T,), dtype=jnp.float32)
    y_std = jnp.abs(jax.random.normal(k4, (T,), dtype=jnp.float32)) + 0.5

    out = wrmse_loss_ratio(y, y_pred, y_mean, y_std, dwt)
    out = jax.block_until_ready(out)
    ref = _ref_wrmse(y, y_pred, y_mean, y_std, dwt)
    assert jnp.allclose(out, ref, rtol=1e-4, atol=1e-5), (out, ref)

    # --- test 2: batch*targets not divisible by 128 -> fallback layout with the
    #     multi-step grid and in-kernel row-masking path (correctness only).
    B2 = 1000
    y2 = jax.random.normal(k1, (B2, T), dtype=jnp.float32)
    y2_pred = y2 + 0.05 * jax.random.normal(k2, (B2, T), dtype=jnp.float32)
    out2 = wrmse_loss_ratio(y2, y2_pred, y_mean, y_std, dwt, max_block_bytes=4096)
    out2 = jax.block_until_ready(out2)
    ref2 = _ref_wrmse(y2, y2_pred, y_mean, y_std, dwt)
    assert jnp.allclose(out2, ref2, rtol=1e-4, atol=1e-5), (out2, ref2)

    # --- test 3: lane-dense repack with a multi-step grid and ragged tail rows.
    B3 = 1040  # total = 8320 -> lane = 128, rows = 65; block cap forces 9 steps
    y3 = jax.random.normal(k1, (B3, T), dtype=jnp.float32)
    y3_pred = y3 + 0.05 * jax.random.normal(k2, (B3, T), dtype=jnp.float32)
    out3 = wrmse_loss_ratio(y3, y3_pred, y_mean, y_std, dwt, max_block_bytes=4096)
    out3 = jax.block_until_ready(out3)
    ref3 = _ref_wrmse(y3, y3_pred, y_mean, y_std, dwt)
    assert jnp.allclose(out3, ref3, rtol=1e-4, atol=1e-5), (out3, ref3)

    print("KERNEL_OK")
</pallas_src>

<mosaic_0001>
module attributes {stable_mosaic.version = 11 : i64} {
  func.func @_min_kernel(%arg0: i32, %arg1: memref<1x512xf32, #tpu.memory_space<vmem>>, %arg2: memref<1x512xf32, #tpu.memory_space<vmem>>, %arg3: memref<1x512xf32, #tpu.memory_space<vmem>>, %arg4: memref<1x1xf32, #tpu.memory_space<vmem>>, %arg5: memref<1x512xf32, #tpu.memory_space<vmem>>) attributes {dimension_semantics = [#tpu.dimension_semantics<arbitrary>], iteration_bounds = array<i64: 1>, scalar_prefetch = 0 : i64, scratch_operands = 1 : i64, tpu.core_type = #tpu.core_type<tc>, window_params = [{transform_indices = @transform_0, window_bounds = array<i64: 1, 512>}, {pipeline_mode = #tpu.pipeline_mode<synchronous>, transform_indices = @transform_1, window_bounds = array<i64: 1, 512>}, {pipeline_mode = #tpu.pipeline_mode<synchronous>, transform_indices = @transform_2, window_bounds = array<i64: 1, 512>}, {pipeline_mode = #tpu.pipeline_mode<synchronous>, transform_indices = @transform_3, window_bounds = array<i64: 1, 1>}]} {
    %c0_i32 = arith.constant 0 : i32
    %0 = arith.cmpi eq, %arg0, %c0_i32 : i32
    %1 = arith.extui %0 : i1 to i32
    %c0_i32_0 = arith.constant 0 : i32
    %2 = arith.cmpi ne, %1, %c0_i32_0 : i32
    scf.if %2 {
      %cst_12 = arith.constant 0x7F800000 : f32
      %16 = vector.broadcast %cst_12 : f32 to vector<1x512xf32>
      %c0_13 = arith.constant 0 : index
      %c0_14 = arith.constant 0 : index
      %17 = vector.load %arg5[%c0_13, %c0_14] : memref<1x512xf32, #tpu.memory_space<vmem>>, vector<1x512xf32>
      tpu.vector_store %arg5[%c0_13, %c0_14], %16 {strides = array<i32>} : memref<1x512xf32, #tpu.memory_space<vmem>>, vector<1x512xf32>,
    } else {
    }
    %c0 = arith.constant 0 : index
    %c0_1 = arith.constant 0 : index
    %3 = vector.load %arg1[%c0, %c0_1] : memref<1x512xf32, #tpu.memory_space<vmem>>, vector<1x512xf32>
    %c0_2 = arith.constant 0 : index
    %c0_3 = arith.constant 0 : index
    %4 = vector.load %arg2[%c0_2, %c0_3] : memref<1x512xf32, #tpu.memory_space<vmem>>, vector<1x512xf32>
    %c0_4 = arith.constant 0 : index
    %c0_5 = arith.constant 0 : index
    %5 = vector.load %arg3[%c0_4, %c0_5] : memref<1x512xf32, #tpu.memory_space<vmem>>, vector<1x512xf32>
    %6 = arith.mulf %3, %4 : vector<1x512xf32>
    %7 = arith.addf %6, %5 : vector<1x512xf32>
    %c0_6 = arith.constant 0 : index
    %c0_7 = arith.constant 0 : index
    %8 = vector.load %arg5[%c0_6, %c0_7] : memref<1x512xf32, #tpu.memory_space<vmem>>, vector<1x512xf32>
    %cst = arith.constant dense<0x7F800000> : vector<512xf32>
    %9 = vector.multi_reduction <minimumf>, %7, %cst [0] : vector<1x512xf32> to vector<512xf32>
    %10 = vector.shape_cast %9 : vector<512xf32> to vector<1x512xf32>
    %11 = arith.minimumf %8, %10 : vector<1x512xf32>
    %c0_8 = arith.constant 0 : index
    %c0_9 = arith.constant 0 : index
    %12 = vector.load %arg5[%c0_8, %c0_9] : memref<1x512xf32, #tpu.memory_space<vmem>>, vector<1x512xf32>
    tpu.vector_store %arg5[%c0_8, %c0_9], %11 {strides = array<i32>} : memref<1x512xf32, #tpu.memory_space<vmem>>, vector<1x512xf32>,
    %c0_i32_10 = arith.constant 0 : i32
    %13 = arith.cmpi eq, %arg0, %c0_i32_10 : i32
    %14 = arith.extui %13 : i1 to i32
    %c0_i32_11 = arith.constant 0 : i32
    %15 = arith.cmpi ne, %14, %c0_i32_11 : i32
    scf.if %15 {
      %c0_12 = arith.constant 0 : index
      %c0_13 = arith.constant 0 : index
      %16 = vector.load %arg5[%c0_12, %c0_13] : memref<1x512xf32, #tpu.memory_space<vmem>>, vector<1x512xf32>
      %17 = vector.shape_cast %16 : vector<1x512xf32> to vector<1x1x512xf32>
      %cst_14 = arith.constant dense<0x7F800000> : vector<1xf32>
      %18 = vector.multi_reduction <minimumf>, %17, %cst_14 [1, 2] : vector<1x1x512xf32> to vector<1xf32>
      %19 = vector.shape_cast %18 : vector<1xf32> to vector<1x1x1xf32>
      %20 = vector.extract %19[0, 0, 0] : f32 from vector<1x1x1xf32>
      %21 = vector.broadcast %20 : f32 to vector<1x1xf32>
      %c0_15 = arith.constant 0 : index
      %c0_16 = arith.constant 0 : index
      %22 = vector.load %arg4[%c0_15, %c0_16] : memref<1x1xf32, #tpu.memory_space<vmem>>, vector<1x1xf32>
      tpu.vector_store %arg4[%c0_15, %c0_16], %21 {strides = array<i32>} : memref<1x1xf32, #tpu.memory_space<vmem>>, vector<1x1xf32>,
    } else {
    }
    return
  }
  func.func @transform_0(%arg0: i32) -> (i32, i32) {
    %c0_i32 = arith.constant 0 : i32
    %c0_i32_0 = arith.constant 0 : i32
    return %arg0, %c0_i32 : i32, i32
  }
  func.func @transform_1(%arg0: i32) -> (i32, i32) {
    %c0_i32 = arith.constant 0 : i32
    %c0_i32_0 = arith.constant 0 : i32
    %c0_i32_1 = arith.constant 0 : i32
    return %c0_i32, %c0_i32_0 : i32, i32
  }
  func.func @transform_2(%arg0: i32) -> (i32, i32) {
    %c0_i32 = arith.constant 0 : i32
    %c0_i32_0 = arith.constant 0 : i32
    %c0_i32_1 = arith.constant 0 : i32
    return %c0_i32, %c0_i32_0 : i32, i32
  }
  func.func @transform_3(%arg0: i32) -> (i32, i32) {
    %c0_i32 = arith.constant 0 : i32
    %c0_i32_0 = arith.constant 0 : i32
    %c0_i32_1 = arith.constant 0 : i32
    return %c0_i32, %c0_i32_0 : i32, i32
  }
}

</mosaic_0001>

<bundles_post_ra>
// kernel: tpu_custom_call.1
= control target key start
LH: loop header
LB: loop body
LE: loop exit
PB: predicated region body
PF: predicated region fallthrough
CT: control target
= control target key end

     0   :  { %8 = vsyncpa [#allocation4], 0  ;;  %s262_s0 = inlined_call_operand.hbm [shape: f32[1,512], index: 0, kind: input, shape index: {}]   ;;  %s263_s1 = inlined_call_operand.hbm [shape: f32[1,512], index: 1, kind: input, shape index: {}]   ;;  %s264_s2 = inlined_call_operand.vmem [shape: f32[1,512], index: 2, kind: input, shape index: {}]   ;;  %s265_s3 = inlined_call_operand.hbm [shape: f32[1,1], index: 3, kind: output, shape index: {}]  }
   0x1   :  { %9 = vsyncpa [#allocation7], 0 }
   0x2   :  { %10 = vsyncpa [#allocation5], 0  ;;  %s199_s12 = smov [#allocation3]   ;;  %s200_s14 = smov [#allocation6]  }
   0x3   :  { %s17_s13 = sshll.u32 %s199_s12, 4  ;;  %s27_s15 = sshll.u32 %s200_s14, 4  ;;  %s18_s13 = int_to_ptr.vmem [resolvable:$true] %s17_s13  ;;  %s28_s15 = int_to_ptr.vmem [resolvable:$true] %s27_s15 }
   0x4   :  { %s127_s18 = scalar_lea.hbm %s262_s0, 64 }
   0x5   :  { %p128_p0 = scmp.ne.s32.totalorder %s262_s0, %s127_s18  ;;  %p131_p1 = scmp.lt.u32.totalorder %s127_s18, %s262_s0 }
   0x7   :  { %p133_p2 = pnand %p131_p1, %p128_p0 }
   0x9   :  { %136 = shalt.err (!%p133_p2)
}
   0xa   :  { %s137_s23 = scalar_lea.vmem %s18_s13, 64  ;;  %p142_p4 = scmp.lt.s32.totalorder %s18_s13, %s18_s13 }
   0xb   :  { %p138_p3 = scmp.ne.s32.totalorder %s18_s13, %s137_s23  ;;  %p143_p5 = scmp.lt.s32.totalorder %s137_s23, %s137_s23 }
   0xd   :  { %p144_p6 = por %p143_p5, %p142_p4 }
   0xf   :  { %p145_p7 = pnand %p144_p6, %p138_p3 }
  0x11   :  { %148 = shalt.err (!%p145_p7)
}
  0x12   :  { %20 = dma.hbm_to_vmem [thread:$0]  %s262_s0, 64, %s18_s13, [#allocation4]  }
  0x13   :  { %s149_s28 = scalar_lea.hbm %s263_s1, 64 }
  0x14   :  { %p150_p8 = scmp.ne.s32.totalorder %s263_s1, %s149_s28  ;;  %p153_p9 = scmp.lt.u32.totalorder %s149_s28, %s263_s1 }
  0x16   :  { %p155_p10 = pnand %p153_p9, %p150_p8 }
  0x18   :  { %158 = shalt.err (!%p155_p10)
}
  0x19   :  { %s159_s6 = scalar_lea.vmem %s28_s15, 64  ;;  %p164_p12 = scmp.lt.s32.totalorder %s28_s15, %s28_s15 }
  0x1a   :  { %p160_p11 = scmp.ne.s32.totalorder %s28_s15, %s159_s6  ;;  %p165_p13 = scmp.lt.s32.totalorder %s159_s6, %s159_s6 }
  0x1c   :  { %p166_p0 = por %p165_p13, %p164_p12 }
  0x1e   :  { %p167_p1 = pnand %p166_p0, %p160_p11 }
  0x20   :  { %170 = shalt.err (!%p167_p1)
}
  0x21   :  { %30 = dma.hbm_to_vmem [thread:$0]  %s263_s1, 64, %s28_s15, [#allocation7]  }
  0x22   :  { %193 = dma.done.wait [#allocation4], 64  }
  0x23   :  { %194 = vsyncadd [#allocation4], 4294967232 }
  0x24   :  { %195 = dma.done.wait [#allocation7], 64  }
  0x25   :  { %196 = vsyncadd [#allocation7], 4294967232  ;;  %v43_v0 = vlaneseq  ;;  %v201_v1 = vmov inf   ;;  %v48_v2 = vld [vmem:[#allocation3] sm:$0xf]  ;;  %vm85_vm1 = vcmask 1040384  }
  0x26   :  { %v49_v3 = vld [vmem:[#allocation6] sm:$0xf]  ;;  %v50_v4 = vld [vmem:[%s264_s2] sm:$0xf]  ;;  %s202_s1 = smov [#allocation8]   ;;  %vm103_vm2 = vcmask 0  }
  0x27   :  { %vm45_vm0 = vcmp.lt.s32.totalorder %v43_v0, 512  ;;  %v51_v5 = vmul.f32 %v49_v3, %v48_v2  ;;  %v66_v9 = vshrl.u32 %v43_v0, 7  ;;  %s111_s2 = sshll.u32 %s202_s1, 4  ;;  %s112_s2 = int_to_ptr.vmem [resolvable:$true] %s111_s2 }
  0x28   :  { %47 = vst.msk [vmem:[#allocation2] sm:$0xf] %vm45_vm0, %v201_v1  ;;  %s171_s11 = scalar_lea.vmem %s112_s2, 16  ;;  %s175_s12 = scalar_lea.vmem %s112_s2, 32 }
  0x29   :  { %v52_v6 = vadd.f32 %v51_v5, %v50_v4  ;;  %v67_v10 = vsub.s32 0, %v66_v9  ;;  %v71_v11 = vsub.s32 1, %v66_v9  ;;  %v75_v12 = vsub.s32 2, %v66_v9  ;;  %p172_p2 = scmp.ne.s32.totalorder %s112_s2, %s171_s11  ;;  %p176_p3 = scmp.lt.s32.totalorder %s112_s2, %s112_s2 }
  0x2a   :  { %v79_v13 = vsub.s32 3, %v66_v9  ;;  %p177_p4 = scmp.lt.s32.totalorder %s175_s12, %s171_s11 }
  0x2c   :  { %p178_p5 = por %p177_p4, %p176_p3 }
  0x2e   :  { %p179_p6 = pnand %p178_p5, %p172_p2 }
  0x2f   :  { %v53_v7 = vld [vmem:[#allocation2] sm:$0xf] }
  0x30   :  { %v54_v8 = vmin.f32 %v53_v7, %v52_v6 }
  0x32   :  { %59 = vst.msk [vmem:[#allocation2] sm:$0xf] %vm45_vm0, %v54_v8 }
  0x39   :  { %v63_v14 = vld [vmem:[#allocation2] sm:$0xf] }
  0x3a   :  { %v68_v15 = vrot.slane %v63_v14, %v67_v10  ;;  %v72_v16 = vrot.slane %v63_v14, %v71_v11  ;;  %v76_v17 = vrot.slane %v63_v14, %v75_v12  ;;  %v80_v18 = vrot.slane %v63_v14, %v79_v13 }
  0x3c   :  { %v86_v19 = vsel %vm85_vm1, %v68_v15, inf  ;;  %v87_v20 = vsel %vm85_vm1, %v72_v16, inf  ;;  %v88_v21 = vsel %vm85_vm1, %v76_v17, inf  ;;  %v89_v22 = vsel %vm85_vm1, %v80_v18, inf }
  0x3d   :  { %v90_v23 = vmin.f32 %v86_v19, %v87_v20  ;;  %v91_v24 = vmin.f32 %v88_v21, %v89_v22 }
  0x3f   :  { %v92_v25 = vmin.f32 %v90_v23, %v91_v24 }
  0x41   :  { %93 = vmin.xlane.f32.xlu0 %v92_v25 }
  0xce   :  { %v94_v26 = vpop.xlane.xlu0 %93 }
  0xcf   :  { %v95_v27 = vrot.slane %v94_v26, 4 }
  0xd1   :  { %v96_v28 = vmin.f32 %v94_v26, %v95_v27 }
  0xd3   :  { %v97_v29 = vrot.slane %v96_v28, 2 }
  0xd5   :  { %v98_v30 = vmin.f32 %v96_v28, %v97_v29 }
  0xd7   :  { %v99_v31 = vrot.slane %v98_v30, 1 }
  0xd9   :  { %v100_v32 = vmin.f32 %v98_v30, %v99_v31 }
  0xdb   :  { %121 = vpush %v100_v32 }
 0x10c   :  { %s122_s10 = spop %121 }
 0x10d   :  { %v102_v33 = vstv %s122_s10 }
 0x10e   :  { %104 = vst.msk [vmem:[#allocation8] sm:$0x1] %vm103_vm2, %v102_v33 }
 0x10f   :  { %182 = shalt.err (!%p179_p6)
}
 0x110   :  { %s183_s15 = scalar_lea.hbm %s265_s3, 16 }
 0x111   :  { %p184_p7 = scmp.ne.s32.totalorder %s265_s3, %s183_s15  ;;  %p187_p8 = scmp.lt.u32.totalorder %s183_s15, %s265_s3 }
 0x113   :  { %p189_p9 = pnand %p187_p8, %p184_p7 }
 0x115   :  { %192 = shalt.err (!%p189_p9)
}
 0x116   :  { %114 = dma.vmem_to_hbm [thread:$0]  %s112_s2, 16, %s265_s3, [#allocation5]  }
 0x117   :  { %197 = dma.done.wait [#allocation5], 16  }
 0x118   :  { %198 = vsyncadd [#allocation5], 4294967280 }
 0x119   :  { %118 = vsyncpa [#allocation4], 1 }
 0x11a   :  { %119 = vsyncpa [#allocation7], 1 }
 0x11b   :  { %120 = vsyncpa [#allocation5], 1 }

</bundles_post_ra>
